<compile_context>
chip_gen: v6e
topology: v6e:2x2x1
jax: 0.10.0
libtpu: 0.0.40
codegen_flags: <defaults>
</compile_context>

<pallas_src>
import jax
import jax.numpy as jnp
from jax.experimental import pallas as pl
from jax.experimental.pallas import tpu as pltpu


def _round_up(x, n):
    return ((x + n - 1) // n) * n


def _choose_tile(dim, unit, cap):
    """Largest multiple of `unit` that divides `dim` and is <= `cap`.

    If `dim` is not a multiple of `unit`, fall back to a full-dim block (legal
    when the block equals the array dim) so the big operands never need to be
    padded / re-materialized in the wrapper.
    """
    if dim % unit != 0:
        return dim
    cap = max(cap, unit)
    best = unit
    t = unit
    lim = min(cap, dim)
    while t <= lim:
        if dim % t == 0:
            best = t
        t += unit
    return best


# ---------------------------------------------------------------------------
# Stage A: W_bar = sum_m w[m] * W_m   (Ws streamed once, native dtype)
# ---------------------------------------------------------------------------
def _wbar_kernel(w_ref, ws_ref, wbar_ref):
    m_total = ws_ref.shape[0]
    if m_total <= 16:
        # Small ensembles: fully unrolled register accumulation (one VMEM
        # store of the result per tile, no per-member scratch traffic).
        acc = w_ref[0] * ws_ref[0].astype(jnp.float32)
        for m in range(1, m_total):
            acc = acc + w_ref[m] * ws_ref[m].astype(jnp.float32)
    else:
        def body(m, acc):
            return acc + w_ref[m] * ws_ref[m].astype(jnp.float32)

        acc = jax.lax.fori_loop(
            1, m_total, body, w_ref[0] * ws_ref[0].astype(jnp.float32)
        )
    wbar_ref[...] = acc.astype(wbar_ref.dtype)


# ---------------------------------------------------------------------------
# Stage B: out = x @ W_bar + b_bar   (tiled matmul with split-K accumulation)
# ---------------------------------------------------------------------------
def _matmul_bias_kernel(x_ref, wbar_ref, bbar_ref, o_ref, acc_ref):
    k = pl.program_id(2)

    @pl.when(k == 0)
    def _():
        acc_ref[...] = jnp.zeros_like(acc_ref)

    acc_ref[...] += jnp.dot(
        x_ref[...], wbar_ref[...], preferred_element_type=jnp.float32
    )

    @pl.when(k == pl.num_programs(2) - 1)
    def _():
        o_ref[...] = (acc_ref[...] + bbar_ref[...]).astype(o_ref.dtype)


def weighted_ensemble_forward(
    x,
    Ws,
    bs,
    weights,
    *,
    normalize=False,
    block_b=256,
    block_n=256,        # v5e: pass 128 to match the 4x128x128 MXU / 16 MiB VMEM
    block_k=512,
    compute_dtype=None,  # None -> Ws.dtype (no silent downcast);
                         # jnp.bfloat16 opts into the fast MXU / low-BW path
):
    """x: [B, D_IN], Ws: [M, D_IN, D_OUT], bs: [M, D_OUT], weights: [M]."""
    M, D_IN, D_OUT = Ws.shape
    B = x.shape[0]
    out_dtype = x.dtype
    if compute_dtype is None:
        compute_dtype = Ws.dtype
    compute_dtype = jnp.dtype(compute_dtype)
    ws_item = jnp.dtype(Ws.dtype).itemsize
    cd_item = compute_dtype.itemsize

    weights = jnp.asarray(weights, dtype=jnp.float32)
    if normalize:
        weights = weights / jnp.sum(weights)  # matches module: w / w.sum()

    # b_bar = sum_m w[m] * b_m  -- tiny [M, D_OUT] reduction, plain XLA op.
    b_bar = jnp.dot(weights, bs.astype(jnp.float32)).reshape(1, D_OUT)

    # --- tile selection (never pads / re-materializes Ws) -------------------
    TB = min(block_b, _round_up(B, 8))
    B_pad = _round_up(B, TB)
    TN = _choose_tile(D_OUT, 128, block_n)
    # Megacore: if the whole output is a single tile, split the column axis so
    # the second TensorCore gets a disjoint half of W_bar to work on.
    if (B_pad // TB) * (D_OUT // TN) == 1 and TN % 256 == 0:
        TN //= 2

    # Stage-B K tile: it is the lane dim of the x block -> multiple of 128 (or
    # full D_IN), capped so the double-buffered W_bar block stays ~2 MiB.
    budget = 2 * 1024 * 1024
    cap_kb = max(128, (budget // max(1, TN * cd_item)) // 128 * 128)
    TKB = _choose_tile(D_IN, 128, min(block_k, cap_kb))

    # Stage-A K tile: only sublane alignment required; cap the (M, TKA, TN)
    # Ws block at ~2 MiB per buffer (fits v5e's 16 MiB scoped default).
    sub_unit = max(8, 32 // cd_item)
    cap_ka = max(
        sub_unit, (budget // max(1, M * TN * ws_item)) // sub_unit * sub_unit
    )
    TKA = _choose_tile(D_IN, sub_unit, cap_ka)
    # TODO(synk): very large ragged D_IN / D_OUT (not 8/128-aligned) fall back
    # to full-dim blocks and may exceed small VMEM budgets.

    # Only x (small relative to Ws) is padded, and only on the batch axis.
    if B_pad != B:
        x = jnp.pad(x, ((0, B_pad - B), (0, 0)))
    if x.dtype != compute_dtype:
        x = x.astype(compute_dtype)

    n_ka = D_IN // TKA
    n_n = D_OUT // TN
    n_b = B_pad // TB
    n_kb = D_IN // TKB

    # ---- Stage A: W_bar reduction ------------------------------------------
    cost_a = pl.CostEstimate(
        flops=2 * M * D_IN * D_OUT,
        transcendentals=0,
        bytes_accessed=M * D_IN * D_OUT * ws_item + D_IN * D_OUT * cd_item + M * 4,
    )
    w_bar = pl.pallas_call(
        _wbar_kernel,
        out_shape=jax.ShapeDtypeStruct((D_IN, D_OUT), compute_dtype),
        grid_spec=pltpu.PrefetchScalarGridSpec(
            num_scalar_prefetch=0,
            grid=(n_ka, n_n),
            in_specs=[
                # ensemble weights: tiny scalar table in SMEM
                pl.BlockSpec(memory_space=pltpu.MemorySpace.SMEM),
                # full member axis in one block per (K, N) tile
                pl.BlockSpec((M, TKA, TN), lambda k, n: (0, k, n)),
            ],
            out_specs=pl.BlockSpec((TKA, TN), lambda k, n: (k, n)),
        ),
        compiler_params=pltpu.CompilerParams(
            dimension_semantics=("parallel", "parallel"),
        ),
        cost_estimate=cost_a,
    )(weights, Ws)

    # ---- Stage B: out = x @ W_bar + b_bar ----------------------------------
    cost_b = pl.CostEstimate(
        flops=2 * B_pad * D_IN * D_OUT,
        transcendentals=0,
        bytes_accessed=(
            n_n * B_pad * D_IN * cd_item        # x streamed once per column tile
            + n_b * D_IN * D_OUT * cd_item      # W_bar streamed once per batch tile
            + D_OUT * 4                         # b_bar
            + B_pad * D_OUT * jnp.dtype(out_dtype).itemsize
        ),
    )
    out = pl.pallas_call(
        _matmul_bias_kernel,
        out_shape=jax.ShapeDtypeStruct((B_pad, D_OUT), out_dtype),
        grid_spec=pltpu.PrefetchScalarGridSpec(
            num_scalar_prefetch=0,
            # Column axis leads so megacore shards disjoint halves of W_bar.
            grid=(n_n, n_b, n_kb),
            in_specs=[
                pl.BlockSpec((TB, TKB), lambda j, i, k: (i, k)),  # x
                pl.BlockSpec((TKB, TN), lambda j, i, k: (k, j)),  # W_bar
                pl.BlockSpec((1, TN), lambda j, i, k: (0, j)),    # b_bar
            ],
            out_specs=pl.BlockSpec((TB, TN), lambda j, i, k: (i, j)),
            scratch_shapes=[pltpu.VMEM((TB, TN), jnp.float32)],   # f32 accumulator
        ),
        compiler_params=pltpu.CompilerParams(
            dimension_semantics=("parallel", "parallel", "arbitrary"),
        ),
        cost_estimate=cost_b,
    )(x, w_bar, b_bar)

    return out[:B]


def _reference(x, Ws, bs, weights, normalize=False):
    w = jnp.asarray(weights, dtype=jnp.float32)
    if normalize:
        w = w / jnp.sum(w)
    outs = jnp.einsum("bi,mio->mbo", x, Ws) + bs[:, None, :]
    return jnp.sum(outs * w[:, None, None], axis=0)


if __name__ == "__main__":
    # TODO(synk): aggregate_tensors' recursion over dict/tuple/None member
    # outputs has no single-kernel equivalent; this covers the tensor-output
    # (nn.Linear member) case, which is the module's core numeric path.

    # --- Case 1: aligned small shapes, default (no-downcast) numerics -------
    M, B, D_IN, D_OUT = 3, 16, 64, 128
    kx, kW, kb = jax.random.split(jax.random.PRNGKey(0), 3)
    x = jax.random.normal(kx, (B, D_IN), dtype=jnp.float32)
    Ws = jax.random.normal(kW, (M, D_IN, D_OUT), dtype=jnp.float32) * 0.1
    bs = jax.random.normal(kb, (M, D_OUT), dtype=jnp.float32) * 0.1
    ew = jnp.array([0.2, 0.3, 0.5], dtype=jnp.float32)

    out = jax.block_until_ready(weighted_ensemble_forward(x, Ws, bs, ew))
    ref = _reference(x, Ws, bs, ew)
    assert out.shape == (B, D_OUT)
    assert jnp.allclose(out, ref, atol=2e-2, rtol=2e-2), float(
        jnp.max(jnp.abs(out - ref))
    )

    # --- Case 2: ragged shapes (full-dim blocks + batch padding), normalize --
    M2, B2, D_IN2, D_OUT2 = 2, 10, 48, 40
    k2x, k2W, k2b = jax.random.split(jax.random.PRNGKey(1), 3)
    x2 = jax.random.normal(k2x, (B2, D_IN2), dtype=jnp.float32)
    Ws2 = jax.random.normal(k2W, (M2, D_IN2, D_OUT2), dtype=jnp.float32) * 0.1
    bs2 = jax.random.normal(k2b, (M2, D_OUT2), dtype=jnp.float32) * 0.1
    w2 = jnp.array([1.5, 0.5], dtype=jnp.float32)

    out2 = jax.block_until_ready(
        weighted_ensemble_forward(x2, Ws2, bs2, w2, normalize=True)
    )
    ref2 = _reference(x2, Ws2, bs2, w2, normalize=True)
    assert out2.shape == (B2, D_OUT2)
    assert jnp.allclose(out2, ref2, atol=2e-2, rtol=2e-2), float(
        jnp.max(jnp.abs(out2 - ref2))
    )

    # --- Case 3: opt-in bf16 fast path (bf16 MXU, halved W_bar traffic) ------
    out3 = jax.block_until_ready(
        weighted_ensemble_forward(x, Ws, bs, ew, compute_dtype=jnp.bfloat16)
    )
    assert jnp.allclose(out3, ref, atol=5e-2, rtol=5e-2), float(
        jnp.max(jnp.abs(out3 - ref))
    )

    print("KERNEL_OK")
</pallas_src>

<mosaic_0001>
module attributes {stable_mosaic.version = 11 : i64} {
  func.func @_wbar_kernel(%arg0: i32, %arg1: i32, %arg2: memref<3xf32, #tpu.memory_space<smem>>, %arg3: memref<3x64x128xf32, #tpu.memory_space<vmem>>, %arg4: memref<64x128xf32, #tpu.memory_space<vmem>>) attributes {dimension_semantics = [#tpu.dimension_semantics<parallel>, #tpu.dimension_semantics<parallel>], iteration_bounds = array<i64: 1, 1>, scalar_prefetch = 0 : i64, scratch_operands = 0 : i64, tpu.core_type = #tpu.core_type<tc>, window_params = [{transform_indices = @transform_0, window_bounds = array<i64: 3>}, {transform_indices = @transform_1, window_bounds = array<i64: 3, 64, 128>}, {transform_indices = @transform_2, window_bounds = array<i64: 64, 128>}]} {
    %c0 = arith.constant 0 : index
    %0 = memref.load %arg2[%c0] : memref<3xf32, #tpu.memory_space<smem>>
    %c0_0 = arith.constant 0 : index
    %c0_1 = arith.constant 0 : index
    %c0_2 = arith.constant 0 : index
    %1 = vector.load %arg3[%c0_0, %c0_1, %c0_2] : memref<3x64x128xf32, #tpu.memory_space<vmem>>, vector<1x64x128xf32>
    %2 = vector.shape_cast %1 : vector<1x64x128xf32> to vector<64x128xf32>
    %3 = vector.broadcast %0 : f32 to vector<64x128xf32>
    %4 = arith.mulf %3, %2 : vector<64x128xf32>
    %c1 = arith.constant 1 : index
    %5 = memref.load %arg2[%c1] : memref<3xf32, #tpu.memory_space<smem>>
    %c1_3 = arith.constant 1 : index
    %c0_4 = arith.constant 0 : index
    %c0_5 = arith.constant 0 : index
    %6 = vector.load %arg3[%c1_3, %c0_4, %c0_5] : memref<3x64x128xf32, #tpu.memory_space<vmem>>, vector<1x64x128xf32>
    %7 = vector.shape_cast %6 : vector<1x64x128xf32> to vector<64x128xf32>
    %8 = vector.broadcast %5 : f32 to vector<64x128xf32>
    %9 = arith.mulf %8, %7 : vector<64x128xf32>
    %10 = arith.addf %4, %9 : vector<64x128xf32>
    %c2 = arith.constant 2 : index
    %11 = memref.load %arg2[%c2] : memref<3xf32, #tpu.memory_space<smem>>
    %c2_6 = arith.constant 2 : index
    %c0_7 = arith.constant 0 : index
    %c0_8 = arith.constant 0 : index
    %12 = vector.load %arg3[%c2_6, %c0_7, %c0_8] : memref<3x64x128xf32, #tpu.memory_space<vmem>>, vector<1x64x128xf32>
    %13 = vector.shape_cast %12 : vector<1x64x128xf32> to vector<64x128xf32>
    %14 = vector.broadcast %11 : f32 to vector<64x128xf32>
    %15 = arith.mulf %14, %13 : vector<64x128xf32>
    %16 = arith.addf %10, %15 : vector<64x128xf32>
    %c0_9 = arith.constant 0 : index
    %c0_10 = arith.constant 0 : index
    %17 = vector.load %arg4[%c0_9, %c0_10] : memref<64x128xf32, #tpu.memory_space<vmem>>, vector<64x128xf32>
    tpu.vector_store %arg4[%c0_9, %c0_10], %16 {strides = array<i32>} : memref<64x128xf32, #tpu.memory_space<vmem>>, vector<64x128xf32>,
    return
  }
  func.func @transform_0(%arg0: i32, %arg1: i32) -> i32 {
    %c0_i32 = arith.constant 0 : i32
    %c0_i32_0 = arith.constant 0 : i32
    return %c0_i32 : i32
  }
  func.func @transform_1(%arg0: i32, %arg1: i32) -> (i32, i32, i32) {
    %c0_i32 = arith.constant 0 : i32
    %c0_i32_0 = arith.constant 0 : i32
    return %c0_i32, %arg0, %arg1 : i32, i32, i32
  }
  func.func @transform_2(%arg0: i32, %arg1: i32) -> (i32, i32) {
    %c0_i32 = arith.constant 0 : i32
    return %arg0, %arg1 : i32, i32
  }
}

</mosaic_0001>

<bundles_post_ra>
// kernel: tpu_custom_call.1
= control target key start
LH: loop header
LB: loop body
LE: loop exit
PB: predicated region body
PF: predicated region fallthrough
CT: control target
= control target key end

     0   :  { %7 = vsyncpa [#allocation5], 0  ;;  %s231_s0 = inlined_call_operand.hbm [shape: f32[3], index: 0, kind: input, shape index: {}]   ;;  %s232_s1 = inlined_call_operand.hbm [shape: f32[3,64,128], index: 1, kind: input, shape index: {}]   ;;  %s233_s2 = inlined_call_operand.hbm [shape: f32[64,128], index: 2, kind: output, shape index: {}]  }
   0x1   :  { %8 = vsyncpa [#allocation3], 0 }
   0x2   :  { %9 = vsyncpa [#allocation4], 0  ;;  %s196_s9 = smov [#allocation2]   ;;  %s197_s12 = smov [#allocation6]  }
   0x3   :  { %17 = dma.hbm_to_smem %s231_s0, 16, %s196_s9, [#allocation5]  }
   0x4   :  { %s23_s13 = sshll.u32 %s197_s12, 4  ;;  %s24_s13 = int_to_ptr.vmem [resolvable:$true] %s23_s13 }
   0x5   :  { %s158_s14 = scalar_lea.vmem %s24_s13, 3072  ;;  %p163_p1 = scmp.lt.s32.totalorder %s24_s13, %s24_s13 }
   0x6   :  { %p159_p0 = scmp.ne.s32.totalorder %s24_s13, %s158_s14  ;;  %p164_p2 = scmp.lt.s32.totalorder %s158_s14, %s158_s14 }
   0x8   :  { %p165_p3 = por %p164_p2, %p163_p1 }
   0xa   :  { %p166_p4 = pnand %p165_p3, %p159_p0 }
   0xc   :  { %169 = shalt.err (!%p166_p4)
}
   0xd   :  { %s198_s15 = smov 128   ;;  %s199_s16 = smov 8  }
   0xe   :  { %29 = dma.hbm_to_vmem [thread:$0]  %s232_s1, 3072, %s24_s13, [#allocation3], %s198_s15, %s198_s15, %s199_s16  }
   0xf   :  { %190 = dma.done.wait [#allocation5], 16  }
  0x10   :  { %191 = vsyncadd [#allocation5], 4294967280 }
  0x11   :  { %192 = dma.done.wait [#allocation3], 3072  }
  0x12   :  { %193 = vsyncadd [#allocation3], 4294964224 }
  0x13   :  { %36 = sfence }
  0x14   :  { %s37_s0 = sld [smem:[#allocation2]]  ;;  %v38_v0 = vld [vmem:[#allocation6] sm:$0xff]  ;;  %v39_v2 = vld [vmem:[#allocation6 + $0x8] sm:$0xff]  ;;  %v40_v3 = vld [vmem:[#allocation6 + $0x10] sm:$0xff]  ;;  %s200_s1 = smov [#allocation7]  }
  0x15   :  { %s135_s19 = sld [smem:[#allocation2 + $0x1]]  ;;  %v57_v1 = vld [vmem:[#allocation6 + $0x40] sm:$0xff]  ;;  %v58_v5 = vld [vmem:[#allocation6 + $0x48] sm:$0xff]  ;;  %v59_v6 = vld [vmem:[#allocation6 + $0x50] sm:$0xff]  ;;  %s122_s21 = sshll.u32 %s200_s1, 4  ;;  %s123_s21 = int_to_ptr.vmem [resolvable:$true] %s122_s21 }
  0x16   :  { %s136_s20 = sld [smem:[#allocation2 + $0x2]]  ;;  %v84_v4 = vld [vmem:[#allocation6 + $0x80] sm:$0xff]  ;;  %v85_v8 = vld [vmem:[#allocation6 + $0x88] sm:$0xff]  ;;  %v86_v9 = vld [vmem:[#allocation6 + $0x90] sm:$0xff]  ;;  %s170_s22 = scalar_lea.vmem %s123_s21, 1024 }
  0x17   :  { %v41_v10 = vld [vmem:[#allocation6 + $0x18] sm:$0xff]  ;;  %v42_v21 = vld [vmem:[#allocation6 + $0x20] sm:$0xff]  ;;  %v43_v32 = vld [vmem:[#allocation6 + $0x28] sm:$0xff]  ;;  %p171_p5 = scmp.ne.s32.totalorder %s123_s21, %s170_s22  ;;  %p175_p6 = scmp.lt.s32.totalorder %s123_s21, %s123_s21 }
  0x18   :  { %v60_v15 = vld [vmem:[#allocation6 + $0x58] sm:$0xff]  ;;  %v61_v22 = vld [vmem:[#allocation6 + $0x60] sm:$0xff]  ;;  %v62_v33 = vld [vmem:[#allocation6 + $0x68] sm:$0xff]  ;;  %p176_p7 = scmp.lt.s32.totalorder %s170_s22, %s170_s22 }
  0x19   :  { %v87_v16 = vld [vmem:[#allocation6 + $0x98] sm:$0xff]  ;;  %v88_v23 = vld [vmem:[#allocation6 + $0xa0] sm:$0xff]  ;;  %v89_v34 = vld [vmem:[#allocation6 + $0xa8] sm:$0xff] }
  0x1a   :  { %v46_v7 = vstv %s37_s0  ;;  %v44_v39 = vld [vmem:[#allocation6 + $0x30] sm:$0xff]  ;;  %v45_v46 = vld [vmem:[#allocation6 + $0x38] sm:$0xff]  ;;  %p177_p8 = por %p176_p7, %p175_p6 }
  0x1b   :  { %v47_v11 = vmul.f32 %v46_v7, %v38_v0  ;;  %v65_v12 = vstv %s135_s19  ;;  %v48_v13 = vmul.f32 %v46_v7, %v39_v2  ;;  %v49_v14 = vmul.f32 %v46_v7, %v40_v3  ;;  %v63_v40 = vld [vmem:[#allocation6 + $0x70] sm:$0xff]  ;;  %v64_v47 = vld [vmem:[#allocation6 + $0x78] sm:$0xff] }
  0x1c   :  { %v66_v17 = vmul.f32 %v65_v12, %v57_v1  ;;  %v92_v18 = vstv %s136_s20  ;;  %v67_v19 = vmul.f32 %v65_v12, %v58_v5  ;;  %v68_v20 = vmul.f32 %v65_v12, %v59_v6  ;;  %v90_v41 = vld [vmem:[#allocation6 + $0xb0] sm:$0xff]  ;;  %v91_v52 = vld [vmem:[#allocation6 + $0xb8] sm:$0xff]  ;;  %p178_p9 = pnand %p177_p8, %p171_p5 }
  0x1d   :  { %v93_v24 = vmul.f32 %v92_v18, %v84_v4  ;;  %v94_v25 = vmul.f32 %v92_v18, %v85_v8  ;;  %v95_v26 = vmul.f32 %v92_v18, %v86_v9  ;;  %v50_v27 = vmul.f32 %v46_v7, %v41_v10 }
  0x1e   :  { %v74_v28 = vadd.f32 %v66_v17, %v47_v11  ;;  %v75_v29 = vadd.f32 %v67_v19, %v48_v13  ;;  %v76_v30 = vadd.f32 %v68_v20, %v49_v14  ;;  %v69_v31 = vmul.f32 %v65_v12, %v60_v15 }
  0x1f   :  { %v96_v35 = vmul.f32 %v92_v18, %v87_v16  ;;  %v51_v36 = vmul.f32 %v46_v7, %v42_v21  ;;  %v70_v37 = vmul.f32 %v65_v12, %v61_v22  ;;  %v97_v38 = vmul.f32 %v92_v18, %v88_v23 }
  0x20   :  { %v101_v42 = vadd.f32 %v93_v24, %v74_v28  ;;  %v102_v43 = vadd.f32 %v94_v25, %v75_v29  ;;  %v103_v44 = vadd.f32 %v95_v26, %v76_v30  ;;  %v77_v45 = vadd.f32 %v69_v31, %v50_v27 }
  0x21   :  { %v78_v48 = vadd.f32 %v70_v37, %v51_v36  ;;  %v52_v49 = vmul.f32 %v46_v7, %v43_v32  ;;  %v71_v50 = vmul.f32 %v65_v12, %v62_v33  ;;  %v98_v51 = vmul.f32 %v92_v18, %v89_v34 }
  0x22   :  { %109 = vst [vmem:[#allocation7] sm:$0xff] %v101_v42  ;;  %110 = vst [vmem:[#allocation7 + $0x8] sm:$0xff] %v102_v43  ;;  %v104_v53 = vadd.f32 %v96_v35, %v77_v45  ;;  %v53_v54 = vmul.f32 %v46_v7, %v44_v39  ;;  %v72_v55 = vmul.f32 %v65_v12, %v63_v40 }
  0x23   :  { %111 = vst [vmem:[#allocation7 + $0x10] sm:$0xff] %v103_v44  ;;  %v99_v56 = vmul.f32 %v92_v18, %v90_v41  ;;  %v105_v57 = vadd.f32 %v97_v38, %v78_v48  ;;  %v79_v58 = vadd.f32 %v71_v50, %v52_v49  ;;  %v54_v59 = vmul.f32 %v46_v7, %v45_v46 }
  0x24   :  { %v73_v60 = vmul.f32 %v65_v12, %v64_v47  ;;  %112 = vst [vmem:[#allocation7 + $0x18] sm:$0xff] %v104_v53  ;;  %v80_v61 = vadd.f32 %v72_v55, %v53_v54  ;;  %v100_v62 = vmul.f32 %v92_v18, %v91_v52 }
  0x25   :  { %113 = vst [vmem:[#allocation7 + $0x20] sm:$0xff] %v105_v57  ;;  %v106_v63 = vadd.f32 %v98_v51, %v79_v58 }
  0x26   :  { %v81_v0 = vadd.f32 %v73_v60, %v54_v59  ;;  %v107_v1 = vadd.f32 %v99_v56, %v80_v61 }
  0x27   :  { %114 = vst [vmem:[#allocation7 + $0x28] sm:$0xff] %v106_v63 }
  0x28   :  { %v108_v2 = vadd.f32 %v100_v62, %v81_v0  ;;  %115 = vst [vmem:[#allocation7 + $0x30] sm:$0xff] %v107_v1 }
  0x2a   :  { %116 = vst [vmem:[#allocation7 + $0x38] sm:$0xff] %v108_v2 }
  0x2b   :  { %181 = shalt.err (!%p178_p9)
}
  0x2c   :  { %128 = dma.vmem_to_hbm [thread:$0]  %s123_s21, 1024, %s233_s2, [#allocation4], %s198_s15, %s198_s15, %s199_s16  }
  0x2d   :  { %194 = dma.done.wait [#allocation4], 1024  }
  0x2e   :  { %195 = vsyncadd [#allocation4], 4294966272 }
  0x2f   :  { %132 = vsyncpa [#allocation3], 1 }
  0x30   :  { %133 = vsyncpa [#allocation4], 1 }
  0x31   :  { %134 = vsyncpa [#allocation5], 1 }

</bundles_post_ra>
